<compile_context>
chip_gen: v5e
topology: v5e:2x2
jax: 0.10.0
libtpu: 0.0.40
codegen_flags: <defaults>
</compile_context>

<pallas_src>
import functools

import jax
import jax.numpy as jnp
import numpy as np
from jax.experimental import pallas as pl
from jax.experimental.pallas import tpu as pltpu


# ---------------------------------------------------------------------------
# Kernel 1: GRU step + Luong attention + context + concat Linear (+ tanh).
# ---------------------------------------------------------------------------
def _prologue_kernel(general, *refs):
    if general:
        (emb_ref, h_prev_ref, enc_ref, wa_ref,
         wih_ref, whh_ref, bi_ref, bh_ref, wc_ref, bc_ref,
         concat_ref, h_new_ref, attn_ref) = refs
    else:
        (emb_ref, h_prev_ref, enc_ref,
         wih_ref, whh_ref, bi_ref, bh_ref, wc_ref, bc_ref,
         concat_ref, h_new_ref, attn_ref) = refs
        wa_ref = None

    f32, bf16 = jnp.float32, jnp.bfloat16
    H = h_prev_ref.shape[-1]

    x = emb_ref[...]                          # (B, H) f32 embedded token
    h = h_prev_ref[...]                       # (B, H) f32 previous hidden

    # ---- single GRU step (PyTorch gate order r, z, n). MXU operands bf16,
    #      f32 accumulation; gate / elementwise math stays f32 on VPU/EUP.
    gi = jnp.dot(x.astype(bf16), wih_ref[...], preferred_element_type=f32) + bi_ref[...]
    gh = jnp.dot(h.astype(bf16), whh_ref[...], preferred_element_type=f32) + bh_ref[...]
    r = jax.nn.sigmoid(gi[:, :H] + gh[:, :H])
    z = jax.nn.sigmoid(gi[:, H:2 * H] + gh[:, H:2 * H])
    n = jnp.tanh(gi[:, 2 * H:] + r * gh[:, 2 * H:])
    h_new = (1.0 - z) * n + z * h             # (B, H) f32 == rnn_output.squeeze(0)

    # ---- Luong attention over encoder outputs in (B, T, H) layout ------------
    enc = enc_ref[...]                        # (B, T, H) bf16
    if general:
        # score(h, e_t) = h . (e_t @ Wa + ba): project the single query instead
        # of every encoder row; the h.ba term is constant over t -> cancels in
        # softmax, so attention weights / outputs are unchanged.
        q = jnp.dot(h_new.astype(bf16), wa_ref[...], preferred_element_type=f32)
    else:
        q = h_new

    if H % 128 == 0:
        # Lane-aligned H (production sizes): score + context through the MXU.
        q3 = q.astype(bf16)[:, None, :]                                      # (B,1,H)
        s = jnp.einsum('bqh,bth->bqt', q3, enc, preferred_element_type=f32)  # (B,1,T)
        s = s - jnp.max(s, axis=-1, keepdims=True)
        p = jnp.exp(s)
        attn3 = p / jnp.sum(p, axis=-1, keepdims=True)                       # (B,1,T)
        ctx = jnp.einsum('bqt,bth->bqh', attn3.astype(bf16), enc,
                         preferred_element_type=f32)                         # (B,1,H)
        context = ctx[:, 0, :]                                               # (B,H)
    else:
        # Small / unaligned H (this test): MXU would be pure padding; use the
        # VPU broadcast-multiply + reduce form.
        encf = enc.astype(f32)
        e = jnp.sum(encf * q[:, None, :], axis=-1)                           # (B,T)
        e = e - jnp.max(e, axis=-1, keepdims=True)
        p = jnp.exp(e)
        attn2 = p / jnp.sum(p, axis=-1, keepdims=True)                       # (B,T)
        context = jnp.sum(attn2[:, :, None] * encf, axis=1)                  # (B,H)
        attn3 = attn2[:, None, :]                                            # (B,1,T)

    # ---- concat Linear + tanh -------------------------------------------------
    if H % 128 == 0:
        # Single fused (B,2H) x (2H,H) MXU dot (lane-aligned in-vreg concat).
        cat = jnp.concatenate([h_new, context], axis=-1).astype(bf16)        # (B,2H)
        pre = jnp.dot(cat, wc_ref[...], preferred_element_type=f32)
    else:
        # Mathematically identical split form (no unaligned lane concat).
        pre = (jnp.dot(h_new.astype(bf16), wc_ref[:H, :], preferred_element_type=f32)
               + jnp.dot(context.astype(bf16), wc_ref[H:, :], preferred_element_type=f32))
    concat_out = jnp.tanh(pre + bc_ref[...])                                 # (B,H) f32

    concat_ref[...] = concat_out.astype(concat_ref.dtype)
    h_new_ref[...] = h_new
    attn_ref[...] = attn3


# ---------------------------------------------------------------------------
# Kernel 2: vocab projection, tiled over the output dimension O.
# ---------------------------------------------------------------------------
def _vocab_proj_kernel(x_ref, w_ref, b_ref, o_ref):
    o_ref[...] = (jnp.dot(x_ref[...], w_ref[...],
                          preferred_element_type=jnp.float32) + b_ref[...])


def _full_spec(shape):
    return pl.BlockSpec(shape, lambda *_: (0,) * len(shape))


# ---------------------------------------------------------------------------
# Wrapper = glue (embedding lookup, (B,T,H) layout, dtype casts) + 2 kernels.
# ---------------------------------------------------------------------------
def luong_attn_decoder_forward(params, input_seq, last_hidden, encoder_outputs,
                               attn_method="dot", tile_o=1024):
    """input_seq: (B,) int32; last_hidden: (1, B, H); encoder_outputs: (T, B, H).
    Returns (output (B, O), hidden (1, B, H), attn_weights (B, 1, T))."""
    emb_table = params["embedding"]
    wih, whh, bi, bh = params["gru"]
    wc, bc = params["concat"]
    wout, bout = params["out"]

    T, B, H = encoder_outputs.shape
    O = wout.shape[1]
    bf16 = jnp.bfloat16

    if attn_method not in ("dot", "general"):
        raise NotImplementedError(f"attn_model '{attn_method}' not supported")
    general = attn_method == "general"

    # Glue: embedding lookup (eval-mode dropout == identity).
    emb = emb_table[input_seq].astype(jnp.float32)                  # (B, H)
    h_prev = last_hidden[0].astype(jnp.float32)                     # (B, H), n_layers==1
    # Lane-dense (B, T, H) layout + bf16 for the dominant tensor. In a real
    # decode loop this transpose/cast is hoisted once per sequence, not per step.
    enc_bth = jnp.transpose(encoder_outputs, (1, 0, 2)).astype(bf16)

    args = [emb, h_prev, enc_bth]
    in_specs = [_full_spec((B, H)), _full_spec((B, H)), _full_spec((B, T, H))]
    if general:
        wa, _ba = params["attn"]
        args.append(wa.T.astype(bf16))       # query-side projection weight
        in_specs.append(_full_spec((H, H)))
    args += [wih.astype(bf16), whh.astype(bf16), bi, bh, wc.astype(bf16), bc]
    in_specs += [_full_spec((H, 3 * H)), _full_spec((H, 3 * H)),
                 _full_spec((1, 3 * H)), _full_spec((1, 3 * H)),
                 _full_spec((2 * H, H)), _full_spec((1, H))]

    concat_out, h_new, attn_weights = pl.pallas_call(
        functools.partial(_prologue_kernel, general),
        out_shape=(jax.ShapeDtypeStruct((B, H), bf16),
                   jax.ShapeDtypeStruct((B, H), jnp.float32),
                   jax.ShapeDtypeStruct((B, 1, T), jnp.float32)),
        grid_spec=pltpu.PrefetchScalarGridSpec(
            num_scalar_prefetch=0, grid=(1,),
            in_specs=in_specs,
            out_specs=[_full_spec((B, H)), _full_spec((B, H)),
                       _full_spec((B, 1, T))]),
        compiler_params=pltpu.CompilerParams(
            dimension_semantics=("arbitrary",),
            vmem_limit_bytes=32 * 1024 * 1024),
    )(*args)

    # ---- vocab projection: W_out streamed tile-by-tile over O, megacore-parallel.
    if O > tile_o:
        assert tile_o % 128 == 0, "tile_o must be a multiple of 128 when tiling O"
        t_o = tile_o
    else:
        t_o = O
    grid_o = pl.cdiv(O, t_o)

    output = pl.pallas_call(
        _vocab_proj_kernel,
        out_shape=jax.ShapeDtypeStruct((B, O), jnp.float32),
        grid_spec=pltpu.PrefetchScalarGridSpec(
            num_scalar_prefetch=0, grid=(grid_o,),
            in_specs=[pl.BlockSpec((B, H), lambda j: (0, 0)),     # resident activation
                      pl.BlockSpec((H, t_o), lambda j: (0, j)),   # streamed weight tile
                      pl.BlockSpec((1, t_o), lambda j: (0, j))],  # streamed bias tile
            out_specs=pl.BlockSpec((B, t_o), lambda j: (0, j))),
        compiler_params=pltpu.CompilerParams(
            dimension_semantics=("parallel",),                    # 2 TCs on v7x
            vmem_limit_bytes=32 * 1024 * 1024),
    )(concat_out, wout.astype(bf16), bout)

    return output, h_new[None], attn_weights


# ---------------------------------------------------------------------------
# Parameter init (PyTorch-like; weights stored transposed so kernels do x @ W).
# ---------------------------------------------------------------------------
def init_params(key, hidden_size, output_size):
    H, O = hidden_size, output_size
    ks = jax.random.split(key, 11)
    bd = 1.0 / np.sqrt(H)
    u = lambda k, shape: jax.random.uniform(k, shape, jnp.float32, -bd, bd)

    emb = jax.random.normal(ks[0], (O, H), jnp.float32)
    gru = (u(ks[1], (H, 3 * H)), u(ks[2], (H, 3 * H)),
           u(ks[3], (1, 3 * H)), u(ks[4], (1, 3 * H)))
    wc = u(ks[5], (2 * H, H))            # Linear(2H -> H), transposed layout
    bc = u(ks[6], (1, H))
    wo = u(ks[7], (H, O))                # Linear(H -> O), transposed layout
    bo = u(ks[8], (1, O))
    wa = u(ks[9], (H, H))                # Attn 'general' Linear(H -> H), transposed
    ba = u(ks[10], (1, H))
    return {"embedding": emb, "gru": gru, "concat": (wc, bc),
            "out": (wo, bo), "attn": (wa, ba)}


# ---------------------------------------------------------------------------
# Pure numpy f32 reference mimicking the PyTorch module (incl. Attn double loop).
# ---------------------------------------------------------------------------
def reference_forward(params, input_seq, last_hidden, encoder_outputs,
                      attn_method="dot"):
    emb_table = np.asarray(params["embedding"], np.float32)
    wih, whh, bi, bh = [np.asarray(p, np.float32) for p in params["gru"]]
    wc, bc = [np.asarray(p, np.float32) for p in params["concat"]]
    wo, bo = [np.asarray(p, np.float32) for p in params["out"]]
    wa, ba = [np.asarray(p, np.float32) for p in params["attn"]]
    enc = np.asarray(encoder_outputs, np.float32)
    T, B, H = enc.shape

    sigmoid = lambda v: 1.0 / (1.0 + np.exp(-v))

    # Embedding + single GRU step.
    x = emb_table[np.asarray(input_seq)]
    h = np.asarray(last_hidden, np.float32)[0]
    gi = x @ wih + bi[0]
    gh = h @ whh + bh[0]
    r = sigmoid(gi[:, :H] + gh[:, :H])
    z = sigmoid(gi[:, H:2 * H] + gh[:, H:2 * H])
    n = np.tanh(gi[:, 2 * H:] + r * gh[:, 2 * H:])
    h_new = (1.0 - z) * n + z * h

    # Attn.forward: explicit B x T loop of scalar scores, then softmax over T.
    energies = np.zeros((B, T), np.float32)
    for b in range(B):
        for t in range(T):
            if attn_method == "dot":
                energies[b, t] = float(np.dot(h_new[b], enc[t, b]))
            else:  # 'general'
                energies[b, t] = float(np.dot(h_new[b], enc[t, b] @ wa + ba[0]))
    e = energies - energies.max(axis=1, keepdims=True)
    p = np.exp(e)
    attn = p / p.sum(axis=1, keepdims=True)                  # (B, T)

    context = np.einsum("bt,tbh->bh", attn, enc)
    concat_input = np.concatenate([h_new, context], axis=1)
    concat_out = np.tanh(concat_input @ wc + bc[0])
    output = concat_out @ wo + bo[0]
    return output, h_new[None], attn[:, None, :]


if __name__ == "__main__":
    HIDDEN = 32          # hidden_size
    OUTPUT_SIZE = 50     # output_size (vocab)
    B, T = 2, 8          # batch, encoder sequence length

    key = jax.random.PRNGKey(0)
    k_params, k_in, k_h, k_enc = jax.random.split(key, 4)
    params = init_params(k_params, HIDDEN, OUTPUT_SIZE)

    input_seq = jax.random.randint(k_in, (B,), 0, OUTPUT_SIZE, jnp.int32)
    last_hidden = jax.random.normal(k_h, (1, B, HIDDEN), jnp.float32)
    encoder_outputs = jax.random.normal(k_enc, (T, B, HIDDEN), jnp.float32)

    for method in ("dot", "general"):
        output, hidden, attn_weights = luong_attn_decoder_forward(
            params, input_seq, last_hidden, encoder_outputs, attn_method=method)
        output = jax.block_until_ready(output)
        hidden = jax.block_until_ready(hidden)
        attn_weights = jax.block_until_ready(attn_weights)

        ref_out, ref_hidden, ref_attn = reference_forward(
            params, input_seq, last_hidden, encoder_outputs, attn_method=method)

        # bf16 MXU operands (f32 accumulation) -> tolerances widened vs pure f32.
        np.testing.assert_allclose(np.asarray(output), ref_out,
                                   atol=2e-2, rtol=2e-2)
        np.testing.assert_allclose(np.asarray(hidden), ref_hidden,
                                   atol=2e-2, rtol=2e-2)
        np.testing.assert_allclose(np.asarray(attn_weights), ref_attn,
                                   atol=2e-2, rtol=2e-2)

        assert output.shape == (B, OUTPUT_SIZE)
        assert hidden.shape == (1, B, HIDDEN)
        assert attn_weights.shape == (B, 1, T)

    print("KERNEL_OK")
</pallas_src>

<mosaic_0001>
module attributes {stable_mosaic.version = 11 : i64} {
  func.func @_prologue_kernel(%arg0: i32, %arg1: memref<2x32xf32, #tpu.memory_space<vmem>>, %arg2: memref<2x32xf32, #tpu.memory_space<vmem>>, %arg3: memref<2x8x32xbf16, #tpu.memory_space<vmem>>, %arg4: memref<32x96xbf16, #tpu.memory_space<vmem>>, %arg5: memref<32x96xbf16, #tpu.memory_space<vmem>>, %arg6: memref<1x96xf32, #tpu.memory_space<vmem>>, %arg7: memref<1x96xf32, #tpu.memory_space<vmem>>, %arg8: memref<64x32xbf16, #tpu.memory_space<vmem>>, %arg9: memref<1x32xf32, #tpu.memory_space<vmem>>, %arg10: memref<2x32xbf16, #tpu.memory_space<vmem>>, %arg11: memref<2x32xf32, #tpu.memory_space<vmem>>, %arg12: memref<2x1x8xf32, #tpu.memory_space<vmem>>) attributes {dimension_semantics = [#tpu.dimension_semantics<arbitrary>], iteration_bounds = array<i64: 1>, scalar_prefetch = 0 : i64, scratch_operands = 0 : i64, tpu.core_type = #tpu.core_type<tc>, window_params = [{pipeline_mode = #tpu.pipeline_mode<synchronous>, transform_indices = @transform_0, window_bounds = array<i64: 2, 32>}, {pipeline_mode = #tpu.pipeline_mode<synchronous>, transform_indices = @transform_1, window_bounds = array<i64: 2, 32>}, {pipeline_mode = #tpu.pipeline_mode<synchronous>, transform_indices = @transform_2, window_bounds = array<i64: 2, 8, 32>}, {pipeline_mode = #tpu.pipeline_mode<synchronous>, transform_indices = @transform_3, window_bounds = array<i64: 32, 96>}, {pipeline_mode = #tpu.pipeline_mode<synchronous>, transform_indices = @transform_4, window_bounds = array<i64: 32, 96>}, {pipeline_mode = #tpu.pipeline_mode<synchronous>, transform_indices = @transform_5, window_bounds = array<i64: 1, 96>}, {pipeline_mode = #tpu.pipeline_mode<synchronous>, transform_indices = @transform_6, window_bounds = array<i64: 1, 96>}, {pipeline_mode = #tpu.pipeline_mode<synchronous>, transform_indices = @transform_7, window_bounds = array<i64: 64, 32>}, {pipeline_mode = #tpu.pipeline_mode<synchronous>, transform_indices = @transform_8, window_bounds = array<i64: 1, 32>}, {pipeline_mode = #tpu.pipeline_mode<synchronous>, transform_indices = @transform_9, window_bounds = array<i64: 2, 32>}, {pipeline_mode = #tpu.pipeline_mode<synchronous>, transform_indices = @transform_10, window_bounds = array<i64: 2, 32>}, {pipeline_mode = #tpu.pipeline_mode<synchronous>, transform_indices = @transform_11, window_bounds = array<i64: 2, 1, 8>}]} {
    %c0 = arith.constant 0 : index
    %c0_0 = arith.constant 0 : index
    %0 = vector.load %arg1[%c0, %c0_0] : memref<2x32xf32, #tpu.memory_space<vmem>>, vector<2x32xf32>
    %c0_1 = arith.constant 0 : index
    %c0_2 = arith.constant 0 : index
    %1 = vector.load %arg2[%c0_1, %c0_2] : memref<2x32xf32, #tpu.memory_space<vmem>>, vector<2x32xf32>
    %2 = arith.truncf %0 : vector<2x32xf32> to vector<2x32xbf16>
    %c0_3 = arith.constant 0 : index
    %c0_4 = arith.constant 0 : index
    %3 = vector.load %arg4[%c0_3, %c0_4] : memref<32x96xbf16, #tpu.memory_space<vmem>>, vector<32x96xbf16>
    %cst = arith.constant dense<0.000000e+00> : vector<2x96xf32>
    %4 = tpu.matmul %2, %3, %cst {dimension_numbers = #tpu.dot_dimension_numbers<[1], [0], [0], [1], [0, 0, 1, 1], [], []>} : vector<2x32xbf16>, vector<32x96xbf16>, vector<2x96xf32> -> vector<2x96xf32>
    %c0_5 = arith.constant 0 : index
    %c0_6 = arith.constant 0 : index
    %5 = vector.load %arg6[%c0_5, %c0_6] : memref<1x96xf32, #tpu.memory_space<vmem>>, vector<1x96xf32>
    %6 = vector.broadcast %5 : vector<1x96xf32> to vector<2x96xf32>
    %7 = arith.addf %4, %6 : vector<2x96xf32>
    %8 = arith.truncf %1 : vector<2x32xf32> to vector<2x32xbf16>
    %c0_7 = arith.constant 0 : index
    %c0_8 = arith.constant 0 : index
    %9 = vector.load %arg5[%c0_7, %c0_8] : memref<32x96xbf16, #tpu.memory_space<vmem>>, vector<32x96xbf16>
    %cst_9 = arith.constant dense<0.000000e+00> : vector<2x96xf32>
    %10 = tpu.matmul %8, %9, %cst_9 {dimension_numbers = #tpu.dot_dimension_numbers<[1], [0], [0], [1], [0, 0, 1, 1], [], []>} : vector<2x32xbf16>, vector<32x96xbf16>, vector<2x96xf32> -> vector<2x96xf32>
    %c0_10 = arith.constant 0 : index
    %c0_11 = arith.constant 0 : index
    %11 = vector.load %arg7[%c0_10, %c0_11] : memref<1x96xf32, #tpu.memory_space<vmem>>, vector<1x96xf32>
    %12 = vector.broadcast %11 : vector<1x96xf32> to vector<2x96xf32>
    %13 = arith.addf %10, %12 : vector<2x96xf32>
    %14 = vector.extract_strided_slice %7 {offsets = [0, 0], sizes = [2, 32], strides = [1, 1]} : vector<2x96xf32> to vector<2x32xf32>
    %15 = vector.extract_strided_slice %13 {offsets = [0, 0], sizes = [2, 32], strides = [1, 1]} : vector<2x96xf32> to vector<2x32xf32>
    %16 = arith.addf %14, %15 : vector<2x32xf32>
    %17 = arith.negf %16 : vector<2x32xf32>
    %18 = math.exp %17 : vector<2x32xf32>
    %cst_12 = arith.constant 1.000000e+00 : f32
    %19 = vector.broadcast %cst_12 : f32 to vector<2x32xf32>
    %20 = arith.addf %19, %18 : vector<2x32xf32>
    %21 = arith.divf %19, %20 : vector<2x32xf32>
    %22 = vector.extract_strided_slice %7 {offsets = [0, 32], sizes = [2, 32], strides = [1, 1]} : vector<2x96xf32> to vector<2x32xf32>
    %23 = vector.extract_strided_slice %13 {offsets = [0, 32], sizes = [2, 32], strides = [1, 1]} : vector<2x96xf32> to vector<2x32xf32>
    %24 = arith.addf %22, %23 : vector<2x32xf32>
    %25 = arith.negf %24 : vector<2x32xf32>
    %26 = math.exp %25 : vector<2x32xf32>
    %cst_13 = arith.constant 1.000000e+00 : f32
    %27 = vector.broadcast %cst_13 : f32 to vector<2x32xf32>
    %28 = arith.addf %27, %26 : vector<2x32xf32>
    %29 = arith.divf %27, %28 : vector<2x32xf32>
    %30 = vector.extract_strided_slice %7 {offsets = [0, 64], sizes = [2, 32], strides = [1, 1]} : vector<2x96xf32> to vector<2x32xf32>
    %31 = vector.extract_strided_slice %13 {offsets = [0, 64], sizes = [2, 32], strides = [1, 1]} : vector<2x96xf32> to vector<2x32xf32>
    %32 = arith.mulf %21, %31 : vector<2x32xf32>
    %33 = arith.addf %30, %32 : vector<2x32xf32>
    %34 = math.tanh %33 : vector<2x32xf32>
    %cst_14 = arith.constant 1.000000e+00 : f32
    %35 = vector.broadcast %cst_14 : f32 to vector<2x32xf32>
    %36 = arith.subf %35, %29 : vector<2x32xf32>
    %37 = arith.mulf %36, %34 : vector<2x32xf32>
    %38 = arith.mulf %29, %1 : vector<2x32xf32>
    %39 = arith.addf %37, %38 : vector<2x32xf32>
    %c0_15 = arith.constant 0 : index
    %c0_16 = arith.constant 0 : index
    %c0_17 = arith.constant 0 : index
    %40 = vector.load %arg3[%c0_15, %c0_16, %c0_17] : memref<2x8x32xbf16, #tpu.memory_space<vmem>>, vector<2x8x32xbf16>
    %41 = arith.extf %40 : vector<2x8x32xbf16> to vector<2x8x32xf32>
    %42 = vector.shape_cast %39 : vector<2x32xf32> to vector<2x1x32xf32>
    %43 = vector.broadcast %42 : vector<2x1x32xf32> to vector<2x8x32xf32>
    %44 = arith.mulf %41, %43 : vector<2x8x32xf32>
    %cst_18 = arith.constant dense<0.000000e+00> : vector<2x8xf32>
    %45 = vector.multi_reduction <add>, %44, %cst_18 [2] : vector<2x8x32xf32> to vector<2x8xf32>
    %cst_19 = arith.constant dense<0xFF800000> : vector<2xf32>
    %46 = vector.multi_reduction <maximumf>, %45, %cst_19 [1] : vector<2x8xf32> to vector<2xf32>
    %47 = vector.shape_cast %46 : vector<2xf32> to vector<2x1xf32>
    %48 = vector.broadcast %47 : vector<2x1xf32> to vector<2x8xf32>
    %49 = arith.subf %45, %48 : vector<2x8xf32>
    %50 = math.exp %49 : vector<2x8xf32>
    %cst_20 = arith.constant dense<0.000000e+00> : vector<2xf32>
    %51 = vector.multi_reduction <add>, %50, %cst_20 [1] : vector<2x8xf32> to vector<2xf32>
    %52 = vector.shape_cast %51 : vector<2xf32> to vector<2x1xf32>
    %53 = vector.broadcast %52 : vector<2x1xf32> to vector<2x8xf32>
    %54 = arith.divf %50, %53 : vector<2x8xf32>
    %55 = vector.shape_cast %54 : vector<2x8xf32> to vector<2x8x1xf32>
    %56 = vector.broadcast %55 : vector<2x8x1xf32> to vector<2x8x32xf32>
    %57 = arith.mulf %56, %41 : vector<2x8x32xf32>
    %cst_21 = arith.constant dense<0.000000e+00> : vector<2x32xf32>
    %58 = vector.multi_reduction <add>, %57, %cst_21 [1] : vector<2x8x32xf32> to vector<2x32xf32>
    %59 = vector.shape_cast %54 : vector<2x8xf32> to vector<2x1x8xf32>
    %60 = arith.truncf %39 : vector<2x32xf32> to vector<2x32xbf16>
    %c0_22 = arith.constant 0 : index
    %c0_23 = arith.constant 0 : index
    %61 = vector.load %arg8[%c0_22, %c0_23] : memref<64x32xbf16, #tpu.memory_space<vmem>>, vector<32x32xbf16>
    %cst_24 = arith.constant dense<0.000000e+00> : vector<2x32xf32>
    %62 = tpu.matmul %60, %61, %cst_24 {dimension_numbers = #tpu.dot_dimension_numbers<[1], [0], [0], [1], [0, 0, 1, 1], [], []>} : vector<2x32xbf16>, vector<32x32xbf16>, vector<2x32xf32> -> vector<2x32xf32>
    %63 = arith.truncf %58 : vector<2x32xf32> to vector<2x32xbf16>
    %c32 = arith.constant 32 : index
    %c0_25 = arith.constant 0 : index
    %64 = vector.load %arg8[%c32, %c0_25] : memref<64x32xbf16, #tpu.memory_space<vmem>>, vector<32x32xbf16>
    %cst_26 = arith.constant dense<0.000000e+00> : vector<2x32xf32>
    %65 = tpu.matmul %63, %64, %cst_26 {dimension_numbers = #tpu.dot_dimension_numbers<[1], [0], [0], [1], [0, 0, 1, 1], [], []>} : vector<2x32xbf16>, vector<32x32xbf16>, vector<2x32xf32> -> vector<2x32xf32>
    %66 = arith.addf %62, %65 : vector<2x32xf32>
    %c0_27 = arith.constant 0 : index
    %c0_28 = arith.constant 0 : index
    %67 = vector.load %arg9[%c0_27, %c0_28] : memref<1x32xf32, #tpu.memory_space<vmem>>, vector<1x32xf32>
    %68 = vector.broadcast %67 : vector<1x32xf32> to vector<2x32xf32>
    %69 = arith.addf %66, %68 : vector<2x32xf32>
    %70 = math.tanh %69 : vector<2x32xf32>
    %71 = arith.truncf %70 : vector<2x32xf32> to vector<2x32xbf16>
    %c0_29 = arith.constant 0 : index
    %c0_30 = arith.constant 0 : index
    %72 = vector.load %arg10[%c0_29, %c0_30] : memref<2x32xbf16, #tpu.memory_space<vmem>>, vector<2x32xbf16>
    tpu.vector_store %arg10[%c0_29, %c0_30], %71 {strides = array<i32>} : memref<2x32xbf16, #tpu.memory_space<vmem>>, vector<2x32xbf16>,
    %c0_31 = arith.constant 0 : index
    %c0_32 = arith.constant 0 : index
    %73 = vector.load %arg11[%c0_31, %c0_32] : memref<2x32xf32, #tpu.memory_space<vmem>>, vector<2x32xf32>
    tpu.vector_store %arg11[%c0_31, %c0_32], %39 {strides = array<i32>} : memref<2x32xf32, #tpu.memory_space<vmem>>, vector<2x32xf32>,
    %c0_33 = arith.constant 0 : index
    %c0_34 = arith.constant 0 : index
    %c0_35 = arith.constant 0 : index
    %74 = vector.load %arg12[%c0_33, %c0_34, %c0_35] : memref<2x1x8xf32, #tpu.memory_space<vmem>>, vector<2x1x8xf32>
    tpu.vector_store %arg12[%c0_33, %c0_34, %c0_35], %59 {strides = array<i32>} : memref<2x1x8xf32, #tpu.memory_space<vmem>>, vector<2x1x8xf32>,
    return
  }
  func.func @transform_0(%arg0: i32) -> (i32, i32) {
    %c0_i32 = arith.constant 0 : i32
    %c0_i32_0 = arith.constant 0 : i32
    %c0_i32_1 = arith.constant 0 : i32
    return %c0_i32, %c0_i32_0 : i32, i32
  }
  func.func @transform_1(%arg0: i32) -> (i32, i32) {
    %c0_i32 = arith.constant 0 : i32
    %c0_i32_0 = arith.constant 0 : i32
    %c0_i32_1 = arith.constant 0 : i32
    return %c0_i32, %c0_i32_0 : i32, i32
  }
  func.func @transform_2(%arg0: i32) -> (i32, i32, i32) {
    %c0_i32 = arith.constant 0 : i32
    %c0_i32_0 = arith.constant 0 : i32
    %c0_i32_1 = arith.constant 0 : i32
    %c0_i32_2 = arith.constant 0 : i32
    return %c0_i32, %c0_i32_0, %c0_i32_1 : i32, i32, i32
  }
  func.func @transform_3(%arg0: i32) -> (i32, i32) {
    %c0_i32 = arith.constant 0 : i32
    %c0_i32_0 = arith.constant 0 : i32
    %c0_i32_1 = arith.constant 0 : i32
    return %c0_i32, %c0_i32_0 : i32, i32
  }
  func.func @transform_4(%arg0: i32) -> (i32, i32) {
    %c0_i32 = arith.constant 0 : i32
    %c0_i32_0 = arith.constant 0 : i32
    %c0_i32_1 = arith.constant 0 : i32
    return %c0_i32, %c0_i32_0 : i32, i32
  }
  func.func @transform_5(%arg0: i32) -> (i32, i32) {
    %c0_i32 = arith.constant 0 : i32
    %c0_i32_0 = arith.constant 0 : i32
    %c0_i32_1 = arith.constant 0 : i32
    return %c0_i32, %c0_i32_0 : i32, i32
  }
  func.func @transform_6(%arg0: i32) -> (i32, i32) {
    %c0_i32 = arith.constant 0 : i32
    %c0_i32_0 = arith.constant 0 : i32
    %c0_i32_1 = arith.constant 0 : i32
    return %c0_i32, %c0_i32_0 : i32, i32
  }
  func.func @transform_7(%arg0: i32) -> (i32, i32) {
    %c0_i32 = arith.constant 0 : i32
    %c0_i32_0 = arith.constant 0 : i32
    %c0_i32_1 = arith.constant 0 : i32
    return %c0_i32, %c0_i32_0 : i32, i32
  }
  func.func @transform_8(%arg0: i32) -> (i32, i32) {
    %c0_i32 = arith.constant 0 : i32
    %c0_i32_0 = arith.constant 0 : i32
    %c0_i32_1 = arith.constant 0 : i32
    return %c0_i32, %c0_i32_0 : i32, i32
  }
  func.func @transform_9(%arg0: i32) -> (i32, i32) {
    %c0_i32 = arith.constant 0 : i32
    %c0_i32_0 = arith.constant 0 : i32
    %c0_i32_1 = arith.constant 0 : i32
    return %c0_i32, %c0_i32_0 : i32, i32
  }
  func.func @transform_10(%arg0: i32) -> (i32, i32) {
    %c0_i32 = arith.constant 0 : i32
    %c0_i32_0 = arith.constant 0 : i32
    %c0_i32_1 = arith.constant 0 : i32
    return %c0_i32, %c0_i32_0 : i32, i32
  }
  func.func @transform_11(%arg0: i32) -> (i32, i32, i32) {
    %c0_i32 = arith.constant 0 : i32
    %c0_i32_0 = arith.constant 0 : i32
    %c0_i32_1 = arith.constant 0 : i32
    %c0_i32_2 = arith.constant 0 : i32
    return %c0_i32, %c0_i32_0, %c0_i32_1 : i32, i32, i32
  }
}

</mosaic_0001>

<bundles_post_ra>
// kernel: tpu_custom_call.1
= control target key start
LH: loop header
LB: loop body
LE: loop exit
PB: predicated region body
PF: predicated region fallthrough
CT: control target
= control target key end

     0   :  { %17 = vsyncpa [#allocation3], 0  ;;  %s749_s0 = inlined_call_operand.vmem [shape: f32[2,32], index: 0, kind: input, shape index: {}]   ;;  %s750_s1 = inlined_call_operand.vmem [shape: f32[2,32], index: 1, kind: input, shape index: {}]   ;;  %s751_s2 = inlined_call_operand.vmem [shape: bf16[2,8,32], index: 2, kind: input, shape index: {}]   ;;  %s752_s3 = inlined_call_operand.vmem [shape: bf16[32,96], index: 3, kind: input, shape index: {}]   ;;  %s753_s4 = inlined_call_operand.vmem [shape: bf16[32,96], index: 4, kind: input, shape index: {}]   ;;  %s754_s5 = inlined_call_operand.vmem [shape: f32[1,96], index: 5, kind: input, shape index: {}]   ;;  %s755_s6 = inlined_call_operand.vmem [shape: f32[1,96], index: 6, kind: input, shape index: {}]   ;;  %s756_s7 = inlined_call_operand.vmem [shape: bf16[64,32], index: 7, kind: input, shape index: {}]   ;;  %s757_s8 = inlined_call_operand.vmem [shape: f32[1,32], index: 8, kind: input, shape index: {}]   ;;  %s758_s9 = inlined_call_operand.hbm [shape: bf16[2,32], index: 9, kind: output, shape index: {0}]   ;;  %s759_s10 = inlined_call_operand.hbm [shape: f32[2,32], index: 10, kind: output, shape index: {1}]   ;;  %s760_s11 = inlined_call_operand.hbm [shape: f32[2,1,8], index: 11, kind: output, shape index: {2}]  }
   0x1   :  { %v464_v0 = vld [vmem:[%s752_s3 + $0x8] sm:$0xff]  ;;  %v463_v2 = vld [vmem:[%s752_s3] sm:$0xff] }
   0x2   :  { %v466_v1 = vld [vmem:[%s753_s4 + $0x8] sm:$0xff]  ;;  %v465_v3 = vld [vmem:[%s753_s4] sm:$0xff]  ;;  %71 = vmatpush.bf16.msra.mxu0 %v464_v0 }
   0x3   :  { %v38_v4 = vld [vmem:[%s749_s0] sm:$0x3]  ;;  %108 = vmatpush.bf16.msra.mxu1 %v466_v1 }
   0x4   :  { %v39_v5 = vld [vmem:[%s750_s1] sm:$0x3] }
   0x5   :  { %18 = vsyncpa [#allocation5], 0  ;;  %v40_v6 = vpack.c.bf16 %v38_v4, %v38_v4  ;;  %v78_v7 = vpack.c.bf16 %v39_v5, %v39_v5  ;;  %vm61_vm0 = vcmask 261120   ;;  %v488_v8 = vld [vmem:[%s755_s6] ss:$0 sm:$0xff]  ;;  %s582_s0 = smov 64   ;;  %v182_v53 = vlaneseq }
   0x6   :  { %72 = vmatpush.bf16.msra.mxu0 %v463_v2  ;;  %v487_v14 = vld [vmem:[%s754_s5] ss:$0 sm:$0xff]  ;;  %s583_s5 = smov 96   ;;  %s584_s6 = smov 32   ;;  %vm186_vm5 = vcmask 1041409   ;;  %vm189_vm6 = vcmask 58368  }
   0x7   :  { %109 = vmatpush.bf16.msra.mxu1 %v465_v3  ;;  %v687_v44 = vld [vmem:[%s751_s2] sm:$0xff]   ;;  %v697_v54 = vand.u32 127, %v182_v53  ;;  %v585_v61 = vmov 0   ;;  %vm374_vm15 = vcmask 57344   ;;  %s395_s21 = sshll.u32 %s759_s10, 4  ;;  %s586_s22 = smov [#allocation4]   ;;  %s396_s21 = int_to_ptr.hbm [resolvable:$true] %s395_s21 }
   0x8   :  { %v473_v45 = vunpack.c.l.bf16 %v687_v44  ;;  %v474_v49 = vunpack.c.h.bf16 %v687_v44  ;;  %485 = vset.pattern.permute.xlu0 %v585_v61  ;;  %484 = vset.pattern.permute.xlu2 %v585_v61  ;;  %s393_s23 = sshll.u32 %s586_s22, 4  ;;  %s587_s24 = smov [#allocation6]   ;;  %s394_s23 = int_to_ptr.vmem [resolvable:$true] %s393_s23 }
   0x9   :  { %434 = vmatmul.msk.bf16.vlgmr.msra.gmra.mxu0 %vm61_vm0, %v40_v6  ;;  %486 = vset.pattern.permute.xlu1 %v585_v61  ;;  %s403_s25 = sshll.u32 %s587_s24, 4  ;;  %s405_s28 = sshll.u32 %s760_s11, 4  ;;  %s404_s25 = int_to_ptr.vmem [resolvable:$true] %s403_s25  ;;  %s406_s28 = int_to_ptr.hbm [resolvable:$true] %s405_s28 }
   0xa   :  { %443 = vmatmul.msk.bf16.vlgmr.msra.gmra.mxu1 %vm61_vm0, %v78_v7  ;;  %s588_s3 = smov 16   ;;  %s589_s4 = smov 1  }
   0xb   :  { %s590_s1 = smov [#allocation2]  }
   0xc   :  { %s382_s29 = sshll.u32 %s590_s1, 4  ;;  %s383_s29 = int_to_ptr.vmem [resolvable:$true] %s382_s29 }
  0x86   :  { %v74_v9 = vpop.f32.mrf.mxu0 }
  0x87   :  { %v111_v10 = vpop.f32.mrf.mxu1  ;;  %v75_v15 = vadd.f32 %v487_v14, %v74_v9 }
  0x88   :  { %v112_v11 = vadd.f32 %v488_v8, %v111_v10 }
  0x8a   :  { %136 = vrot.lane.b32.xlu0 %v112_v11, %s582_s0  ;;  %v115_v16 = vadd.f32 %v112_v11, %v75_v15 }
  0x8c   :  { %v444_v17 = vmul.f32 -1.442695, %v115_v16 }
  0x8e   :  { %v76_v13 = vpop.f32.mrf.mxu0  ;;  %490 = vpow2.f32 %v444_v17 }
  0x8f   :  { %v113_v12 = vpop.f32.mrf.mxu1 }
  0x94   :  { %v491_v18 = vpop.eup %490 }
  0x95   :  { %v119_v19 = vadd.f32 1.0, %v491_v18 }
  0x97   :  { %492 = vrcp.f32 %v119_v19  ;;  %v131_v25 = vand.u32 2147483648, %v119_v19  ;;  %vm125_vm2 = vweird.f32 %v119_v19  ;;  %v129_v26 = vand.u32 2147483647, %v119_v19 }
  0x99   :  { %v132_v28 = vor.u32 1.1754944e-38, %v131_v25  ;;  %vm130_vm4 = vcmp.eq.f32.partialorder %v129_v26, 8.507059e+37 }
  0x9d   :  { %v493_v20 = vpop.eup %492 }
  0x9e   :  { %v121_v21 = vmul.f32 %v493_v20, %v119_v19  ;;  %vm126_vm1 = vweird.f32 %v493_v20 }
  0x9f   :  { %vm127_vm3 = vmor %vm125_vm2, %vm126_vm1  ;;  %vm368_vm1 = vcmask 254976  }
  0xa0   :  { %v122_v22 = vsub.f32 1.0, %v121_v21 }
  0xa2   :  { %v123_v23 = vmul.f32 %v493_v20, %v122_v22 }
  0xa4   :  { %v124_v24 = vadd.f32 %v493_v20, %v123_v23 }
  0xa6   :  { %v128_v27 = vsel %vm127_vm3, %v493_v20, %v124_v24 }
  0xa7   :  { %v133_v30 = vsel %vm130_vm4, %v132_v28, %v128_v27 }
  0xa8   :  { %v146_v36 = vsub.f32 1.0, %v133_v30 }
  0xfc   :  { %v137_v29 = vpop.permute.xlu0 %136 }
  0xfd   :  { %v139_v31 = vmul.f32 %v137_v29, %v133_v30 }
  0xff   :  { %141 = vrot.lane.b32.xlu0 %v139_v31, %s582_s0 }
 0x171   :  { %v142_v32 = vpop.permute.xlu0 %141 }
 0x172   :  { %v144_v33 = vadd.f32 %v142_v32, %v75_v15 }
 0x174   :  { %494 = vtanh.f32 %v144_v33 }
 0x17a   :  { %v495_v34 = vpop.eup %494 }
 0x17b   :  { %148 = vrot.lane.b32.xlu1 %v495_v34, %s583_s5 }
 0x183   :  { %153 = vrot.lane.b32.xlu1 %v39_v5, %s584_s6  ;;  %s384_s6 = sshll.u32 %s758_s9, 4  ;;  %s385_s6 = int_to_ptr.hbm [resolvable:$true] %s384_s6 }
 0x1ed   :  { %v149_v35 = vpop.permute.xlu1 %148 }
 0x1ee   :  { %v151_v38 = vmul.f32 %v149_v35, %v146_v36 }
 0x1f5   :  { %v154_v37 = vpop.permute.xlu1 %153 }
 0x1f6   :  { %v156_v39 = vmul.f32 %v154_v37, %v133_v30 }
 0x1f8   :  { %v678_v40 = vadd.f32 %v156_v39, %v151_v38  ;;  %v468_v39 = vld [vmem:[%s756_s7 + $0x8] sm:$0xff] }
 0x1f9   :  { %349 = vmatpush.bf16.msra.mxu3 %v468_v39 }
 0x1fa   :  { %v164_v41 = vperm.slane %v678_v40, 0  ;;  %v163_v42 = vrot.slane %v678_v40, 1  ;;  %v280_v38 = vpack.c.bf16 %v678_v40, %v678_v40 }
 0x1fc   :  { %166 = vrot.lane.b32.xlu2 %v164_v41, %s583_s5  ;;  %v165_v43 = vperm.slane %v163_v42, 0  ;;  %v467_v41 = vld [vmem:[%s756_s7] sm:$0xff] }
 0x1fd   :  { %350 = vmatpush.bf16.msra.mxu3 %v467_v41 }
 0x204   :  { %168 = vrot.lane.b32.xlu2 %v165_v43, %s583_s5 }
 0x256   :  { %v167_v46 = vpop.permute.xlu2 %166 }
 0x257   :  { %v172_v47 = vmul.f32 %v473_v45, %v167_v46 }
 0x259   :  { %v174_v48 = vsel %vm61_vm0, %v172_v47, 0.0  ;;  %v469_v47 = vld [vmem:[%s756_s7 + $0x10] sm:$0xff] }
 0x25a   :  { %175 = vadd.xlane.f32.xlu0 %v174_v48 }
 0x25e   :  { %v169_v50 = vpop.permute.xlu2 %168 }
 0x25f   :  { %v173_v51 = vmul.f32 %v474_v49, %v169_v50 }
 0x261   :  { %v177_v52 = vsel %vm61_vm0, %v173_v51, 0.0 }
 0x262   :  { %178 = vadd.xlane.f32.xlu1 %v177_v52 }
 0x2cd   :  { %v176_v55 = vpop.xlane.xlu0 %175 }
 0x2ce   :  { %v184_v57 = vperm.slane %v176_v55, %v697_v54 }
 0x2d5   :  { %v179_v56 = vpop.xlane.xlu1 %178 }
 0x2d6   :  { %v185_v58 = vperm.slane %v179_v56, %v697_v54 }
 0x2d8   :  { %v187_v59 = vsel %vm186_vm5, %v185_v58, %v184_v57 }
 0x2d9   :  { %v190_v60 = vsel %vm189_vm6, %v187_v59, -inf }
 0x2da   :  { %191 = vmax.xlane.f32.xlu2 %v190_v60 }
 0x34d   :  { %v192_v62 = vpop.xlane.xlu2 %191 }
 0x34e   :  { %v194_v63 = vperm.slane %v192_v62, 0  ;;  %v195_v0 = vperm.slane %v192_v62, 1 }
 0x350   :  { %v198_v1 = vsub.f32 %v176_v55, %v194_v63  ;;  %v199_v2 = vsub.f32 %v179_v56, %v195_v0 }
 0x352   :  { %v200_v3 = vmul.f32 1.442695, %v198_v1  ;;  %v202_v4 = vmul.f32 1.442695, %v199_v2 }
 0x354   :  { %496 = vpow2.f32 %v200_v3 }
 0x355   :  { %498 = vpow2.f32 %v202_v4 }
 0x35a   :  { %v497_v5 = vpop.eup %496 }
 0x35b   :  { %v499_v6 = vpop.eup %498  ;;  %207 = vperm.xlu2 %484, %v497_v5  }
 0x35c   :  { %210 = vperm.xlu0 %485, %v499_v6  }
 0x3b5   :  { %v208_v7 = vpop.permute.xlu2 %207 }
 0x3b6   :  { %v212_v9 = vperm.slane %v208_v7, %v697_v54 }
 0x3ce   :  { %v211_v8 = vpop.permute.xlu0 %210 }
 0x3cf   :  { %v213_v10 = vperm.slane %v211_v8, %v697_v54 }
 0x3d1   :  { %v214_v11 = vsel %vm186_vm5, %v213_v10, %v212_v9  ;;  %v489_v9 = vld [vmem:[%s757_s8] ss:$0 sm:$0xff] }
 0x3d2   :  { %v216_v12 = vsel %vm189_vm6, %v214_v11, 0.0 }
 0x3d3   :  { %217 = vadd.xlane.f32.xlu1 %v216_v12 }
 0x446   :  { %v218_v13 = vpop.xlane.xlu1 %217 }
 0x447   :  { %v220_v14 = vperm.slane %v218_v13, 0  ;;  %v221_v15 = vperm.slane %v218_v13, 1 }
 0x449   :  { %500 = vrcp.f32 %v220_v14  ;;  %v235_v22 = vand.u32 2147483648, %v220_v14  ;;  %v250_v23 = vand.u32 2147483648, %v221_v15  ;;  %v233_v25 = vand.u32 2147483647, %v220_v14 }
 0x44a   :  { %502 = vrcp.f32 %v221_v15  ;;  %v248_v27 = vand.u32 2147483647, %v221_v15  ;;  %vm229_vm9 = vweird.f32 %v220_v14  ;;  %vm244_vm10 = vweird.f32 %v221_v15 }
 0x44b   :  { %v236_v30 = vor.u32 1.1754944e-38, %v235_v22  ;;  %v251_v31 = vor.u32 1.1754944e-38, %v250_v23  ;;  %vm234_vm13 = vcmp.eq.f32.partialorder %v233_v25, 8.507059e+37 }
 0x44c   :  { %vm249_vm14 = vcmp.eq.f32.partialorder %v248_v27, 8.507059e+37 }
 0x44f   :  { %v501_v16 = vpop.eup %500 }
 0x450   :  { %v503_v17 = vpop.eup %502  ;;  %v225_v18 = vmul.f32 %v501_v16, %v220_v14  ;;  %vm230_vm7 = vweird.f32 %v501_v16 }
 0x451   :  { %v240_v19 = vmul.f32 %v503_v17, %v221_v15  ;;  %vm245_vm8 = vweird.f32 %v503_v17  ;;  %vm231_vm11 = vmor %vm229_vm9, %vm230_vm7 }
 0x452   :  { %v226_v20 = vsub.f32 1.0, %v225_v18  ;;  %vm246_vm12 = vmor %vm244_vm10, %vm245_vm8 }
 0x453   :  { %v241_v21 = vsub.f32 1.0, %v240_v19 }
 0x454   :  { %v227_v24 = vmul.f32 %v501_v16, %v226_v20 }
 0x455   :  { %v242_v26 = vmul.f32 %v503_v17, %v241_v21 }
 0x456   :  { %v228_v28 = vadd.f32 %v501_v16, %v227_v24 }
 0x457   :  { %v243_v29 = vadd.f32 %v503_v17, %v242_v26 }
 0x458   :  { %v232_v32 = vsel %vm231_vm11, %v501_v16, %v228_v28 }
 0x459   :  { %v247_v33 = vsel %vm246_vm12, %v503_v17, %v243_v29  ;;  %v237_v34 = vsel %vm234_vm13, %v236_v30, %v232_v32 }
 0x45a   :  { %v252_v35 = vsel %vm249_vm14, %v251_v31, %v247_v33  ;;  %v238_v36 = vmul.f32 %v497_v5, %v237_v34 }
 0x45b   :  { %v253_v37 = vmul.f32 %v499_v6, %v252_v35 }
 0x45c   :  { %256 = vperm.xlu1 %486, %v238_v36  }
 0x45d   :  { %261 = vperm.xlu2 %484, %v253_v37  }
 0x464   :  { %365 = vrot.lane.b32.xlu1 %v678_v40, %s583_s5  ;;  %v470_v40 = vld [vmem:[%s756_s7 + $0x18] sm:$0xff] }
 0x465   :  { %326 = vrot.lane.b32.xlu2 %v280_v38, %s583_s5  ;;  %318 = vmatpush.bf16.msra.mxu2 %v470_v40 }
 0x469   :  { %319 = vmatpush.bf16.msra.mxu2 %v469_v47 }
 0x4b7   :  { %v262_v42 = vpop.permute.xlu2 %261 }
 0x4b8   :  { %v371_v43 = vperm.slane %v262_v42, %v697_v54  ;;  %v265_v46 = vmul.f32 %v474_v49, %v262_v42 }
 0x4ba   :  { %376 = vst.msk [vmem:[#allocation6 + $0x1] sm:$0x1] %vm374_vm15, %v371_v43  ;;  %v273_v50 = vsel %vm61_vm0, %v265_v46, 0.0 }
 0x4bb   :  { %v274_v51 = vrot.slane %v273_v50, 4 }
 0x4bd   :  { %v275_v52 = vadd.f32 %v274_v51, %v273_v50 }
 0x4bf   :  { %v327_v48 = vpop.permute.xlu2 %326  ;;  %v276_v53 = vrot.slane %v275_v52, 2 }
 0x4c0   :  { %462 = vmatmul.msk.bf16.vlgmr.msra.gmra.mxu3 %vm61_vm0, %v327_v48 }
 0x4c1   :  { %v277_v57 = vadd.f32 %v276_v53, %v275_v52 }
 0x4c3   :  { %v278_v60 = vrot.slane %v277_v57, 1 }
 0x4c5   :  { %v279_v0 = vadd.f32 %v278_v60, %v277_v57 }
 0x4c7   :  { %v286_v44 = vpack.c.bf16 %v279_v0, %v279_v0 }
 0x4ce   :  { %v257_v55 = vpop.permute.xlu1 %256 }
 0x4cf   :  { %v264_v56 = vmul.f32 %v473_v45, %v257_v55  ;;  %v370_v49 = vperm.slane %v257_v55, %v697_v54  ;;  %v294_v54 = vunpack.c.l.b16 %v286_v44 }
 0x4d1   :  { %v266_v58 = vsel %vm61_vm0, %v264_v56, 0.0  ;;  %375 = vst.msk [vmem:[#allocation6] sm:$0x1] %vm374_vm15, %v370_v49 }
 0x4d2   :  { %v267_v59 = vrot.slane %v266_v58, 4 }
 0x4d4   :  { %v268_v61 = vadd.f32 %v267_v59, %v266_v58 }
 0x4d6   :  { %v269_v62 = vrot.slane %v268_v61, 2  ;;  %v366_v63 = vpop.permute.xlu1 %365 }
 0x4d7   :  { %369 = vst.msk [vmem:[#allocation4] sm:$0x3] %vm368_vm1, %v366_v63 }
 0x4d8   :  { %v270_v1 = vadd.f32 %v269_v62, %v268_v61  ;;  %398 = dma.vmem_to_hbm [thread:$0]  %s394_s23, 32, %s396_s21, [#allocation5]  }
 0x4d9   :  { %411 = dma.vmem_to_hbm [thread:$0]  %s404_s25, 32, %s406_s28, [#allocation5], %s588_s3, %s588_s3, %s589_s4  }
 0x4da   :  { %v271_v2 = vrot.slane %v270_v1, 1 }
 0x4dc   :  { %v272_v3 = vadd.f32 %v271_v2, %v270_v1 }
 0x4de   :  { %v285_v45 = vpack.c.bf16 %v272_v3, %v272_v3 }
 0x4e0   :  { %v293_v4 = vunpack.c.l.b16 %v285_v45 }
 0x4e2   :  { %v295_v5 = vsel %vm186_vm5, %v294_v54, %v293_v4 }
 0x4e3   :  { %v296_v6 = vpack.c.b16 %v295_v5, %v295_v5 }
 0x4e5   :  { %453 = vmatmul.msk.bf16.vlgmr.msra.gmra.mxu2 %vm61_vm0, %v296_v6  ;;  %vm363_vm0 = vcmask 253952  }
 0x543   :  { %v352_v7 = vpop.f32.mrf.mxu3 }
 0x54b   :  { %v354_v8 = vpop.f32.mrf.mxu3 }
 0x568   :  { %v321_v10 = vpop.f32.mrf.mxu2 }
 0x569   :  { %v353_v11 = vadd.f32 %v352_v7, %v321_v10 }
 0x56b   :  { %v360_v12 = vadd.f32 %v489_v9, %v353_v11 }
 0x56d   :  { %504 = vtanh.f32 %v360_v12 }
 0x570   :  { %v323_v13 = vpop.f32.mrf.mxu2 }
 0x573   :  { %v505_v14 = vpop.eup %504 }
 0x574   :  { %v362_v15 = vpack.c.bf16 %v505_v14, %v505_v14 }
 0x576   :  { %364 = vst.msk [vmem:[#allocation2] sm:$0x1] %vm363_vm0, %v362_v15 }
 0x577   :  { %387 = dma.vmem_to_hbm [thread:$0]  %s383_s29, 16, %s385_s6, [#allocation3]  }
 0x578   :  { %578 = dma.done.wait [#allocation3], 16  }
 0x579   :  { %579 = vsyncadd [#allocation3], 4294967280 }
 0x57a   :  { %580 = dma.done.wait [#allocation5], 64  }
 0x57b   :  { %581 = vsyncadd [#allocation5], 4294967232 }
 0x57c   :  { %424 = vsyncpa [#allocation3], 1 }
 0x57d   :  { %425 = vsyncpa [#allocation5], 1 }

</bundles_post_ra>
